<compile_context>
chip_gen: v6e
topology: v6e:2x2x1
jax: 0.10.0
libtpu: 0.0.40
codegen_flags: <defaults>
</compile_context>

<pallas_src>
import jax
import jax.numpy as jnp
from jax.experimental import pallas as pl
from jax.experimental.pallas import tpu as pltpu


def _hw_tile_cap(c, max_bytes_per_buf=4 << 20):
    """Largest lane count per streamed block (multiple of 128) such that one
    double-buffered (C, tile) f32 input block stays well inside the default
    scoped VMEM on every TPU generation (v5e 16 MiB, v6e/v7x 32 MiB)."""
    return max(128, ((max_bytes_per_buf // (c * 4)) // 128) * 128)


def _make_ca_kernel(inv_hw, thw):
    """Fused GAP + (1x1 conv -> ReLU -> 1x1 conv) kernel body generator."""
    full_chunks = thw // 128
    aligned = (thw % 128 == 0) and full_chunks > 0

    def kernel(x_ref, w1_ref, b1_ref, w2_ref, b2_ref, o_ref, acc_ref):
        # x_ref:  (C, THW)  one batch element, one spatial tile (HW on lanes)
        # w1_ref: (Cr, C)   first 1x1 conv weight   b1_ref: (Cr, 1)
        # w2_ref: (C, Cr)   second 1x1 conv weight  b2_ref: (C, 1)
        # o_ref:  (C, 1)    per-batch channel attention output
        # acc_ref:(C, 128)  f32 lane-wide running sum across the HW grid axis
        t = pl.program_id(1)

        @pl.when(t == 0)
        def _init():
            acc_ref[...] = jnp.zeros_like(acc_ref)

        if aligned:
            # Lane-wide VPU accumulation: one acc load/store per tile, plain
            # vector adds per 128-lane chunk (static offsets -> aligned vld).
            acc = acc_ref[...]
            for j in range(full_chunks):
                acc = acc + x_ref[:, j * 128:(j + 1) * 128]
            acc_ref[...] = acc
        # else: thw < 128 / unaligned => single full-HW tile by construction;
        # the reduce happens directly from x_ref in the finalize below.

        @pl.when(t == pl.num_programs(1) - 1)
        def _finalize():
            if aligned:
                gap_col = jnp.sum(acc_ref[...], axis=1, keepdims=True) * inv_hw
            else:
                gap_col = jnp.sum(x_ref[...], axis=1, keepdims=True) * inv_hw
            # (Cr, C) @ (C, 1) -> (Cr, 1), ReLU, (C, Cr) @ (Cr, 1) -> (C, 1)
            h = jnp.dot(w1_ref[...], gap_col,
                        preferred_element_type=jnp.float32)
            h = jnp.maximum(h + b1_ref[...], 0.0)
            out = jnp.dot(w2_ref[...], h, preferred_element_type=jnp.float32)
            o_ref[...] = (out + b2_ref[...]).astype(o_ref.dtype)

    return kernel


def channel_attention(x_nchw, w1, b1, w2, b2, *, hw_tile=None):
    """x_nchw: (B, C, H, W) f32; Conv2d-1x1 params w1 (Cr,C,1,1), b1 (Cr,),
    w2 (C,Cr,1,1), b2 (C,). Returns (B, C, 1, 1), matching the PyTorch module."""
    B, C, H, W = x_nchw.shape
    Cr = w1.shape[0]
    HW = H * W

    # Free reshape (no transpose): channels on sublanes, HW on lanes.
    x = x_nchw.reshape(B, C, HW)

    cap_lanes = _hw_tile_cap(C)
    if hw_tile is not None:
        assert hw_tile == HW or hw_tile % 128 == 0, hw_tile
        thw = hw_tile
    elif HW <= cap_lanes:
        thw = HW                      # single full-HW block per batch element
    else:
        thw = cap_lanes               # 128-aligned streaming tile

    hw_pad = ((HW + thw - 1) // thw) * thw
    if hw_pad != HW:
        # Zero-pad the streamed axis: zeros add nothing to the sum and we
        # divide by the true HW, so the mean stays exact; keeps every block
        # 128-aligned and inside the VMEM cap (no full-HW fallback).
        x = jnp.pad(x, ((0, 0), (0, 0), (0, hw_pad - HW)))
    n_tiles = hw_pad // thw
    assert (thw % 128 == 0) or n_tiles == 1, (thw, n_tiles)

    # 1x1 conv params as plain matrices / column biases (free reshapes).
    w1m = w1.reshape(Cr, C)
    w2m = w2.reshape(C, Cr)
    b1c = b1.reshape(Cr, 1)
    b2c = b2.reshape(C, 1)

    out = pl.pallas_call(
        _make_ca_kernel(1.0 / HW, thw),
        out_shape=jax.ShapeDtypeStruct((B, C, 1), x.dtype),
        grid_spec=pltpu.PrefetchScalarGridSpec(
            num_scalar_prefetch=0,
            grid=(B, n_tiles),
            in_specs=[
                pl.BlockSpec((pl.Squeezed(), C, thw), lambda b, t: (b, 0, t)),
                # Constant index maps: weights/biases DMA'd once, stay resident.
                pl.BlockSpec((Cr, C), lambda b, t: (0, 0)),
                pl.BlockSpec((Cr, 1), lambda b, t: (0, 0)),
                pl.BlockSpec((C, Cr), lambda b, t: (0, 0)),
                pl.BlockSpec((C, 1), lambda b, t: (0, 0)),
            ],
            out_specs=pl.BlockSpec((pl.Squeezed(), C, 1), lambda b, t: (b, 0, 0)),
            scratch_shapes=[pltpu.VMEM((C, 128), jnp.float32)],
        ),
        compiler_params=pltpu.CompilerParams(
            dimension_semantics=("parallel", "arbitrary")),
    )(x, w1m, b1c, w2m, b2c)

    return out.reshape(B, C, 1, 1)


def channel_attention_ref(x_nchw, w1, b1, w2, b2):
    """Pure-JAX reference mirroring the PyTorch ChannelAttention module."""
    B, C, H, W = x_nchw.shape
    Cr = w1.shape[0]
    gap = jnp.mean(x_nchw, axis=(2, 3))                 # (B, C)
    h = jnp.maximum(gap @ w1.reshape(Cr, C).T + b1, 0.0)  # (B, Cr)
    out = h @ w2.reshape(C, Cr).T + b2                  # (B, C)
    return out.reshape(B, C, 1, 1)


if __name__ == "__main__":
    # Config consistent with dual_percep_reward(channel=32) -> ChannelAttention(32, 8).
    B, C, H, W = 2, 32, 16, 16
    reduction = 8
    Cr = C // reduction

    key = jax.random.PRNGKey(0)
    kx, kw1, kb1, kw2, kb2, kx2 = jax.random.split(key, 6)

    x = jax.random.normal(kx, (B, C, H, W), dtype=jnp.float32)
    # Conv2d 1x1 parameter shapes: (out, in, 1, 1) / (out,).
    w1 = jax.random.normal(kw1, (Cr, C, 1, 1), dtype=jnp.float32) * 0.1
    b1 = jax.random.normal(kb1, (Cr,), dtype=jnp.float32) * 0.1
    w2 = jax.random.normal(kw2, (C, Cr, 1, 1), dtype=jnp.float32) * 0.1
    b2 = jax.random.normal(kb2, (C,), dtype=jnp.float32) * 0.1

    ref = channel_attention_ref(x, w1, b1, w2, b2)

    # Single-tile path (whole HW in one lane-dense block, 2 lane chunks).
    out1 = jax.block_until_ready(channel_attention(x, w1, b1, w2, b2))
    # Multi-tile path (exercises the pl.when init / lane-wide accumulator).
    out2 = jax.block_until_ready(channel_attention(x, w1, b1, w2, b2, hw_tile=128))
    assert out1.shape == (B, C, 1, 1), out1.shape
    assert jnp.allclose(out1, ref, atol=1e-5, rtol=1e-5), "single-tile mismatch"
    assert jnp.allclose(out2, ref, atol=1e-5, rtol=1e-5), "multi-tile mismatch"

    # Unaligned HW (9x9 = 81 lanes): single-tile direct-reduce fallback path.
    x3 = jax.random.normal(kx2, (B, C, 9, 9), dtype=jnp.float32)
    ref3 = channel_attention_ref(x3, w1, b1, w2, b2)
    out3 = jax.block_until_ready(channel_attention(x3, w1, b1, w2, b2))
    assert jnp.allclose(out3, ref3, atol=1e-5, rtol=1e-5), "unaligned-HW mismatch"

    # Non-divisible HW (12x12 = 144) with 128-lane tiles: zero-padding path.
    x4 = jax.random.normal(kx2, (B, C, 12, 12), dtype=jnp.float32)
    ref4 = channel_attention_ref(x4, w1, b1, w2, b2)
    out4 = jax.block_until_ready(channel_attention(x4, w1, b1, w2, b2, hw_tile=128))
    assert jnp.allclose(out4, ref4, atol=1e-5, rtol=1e-5), "padded-HW mismatch"

    print("KERNEL_OK")
</pallas_src>

<mosaic_0001>
module attributes {stable_mosaic.version = 11 : i64} {
  func.func @kernel(%arg0: i32, %arg1: i32, %arg2: memref<1x32x256xf32, #tpu.memory_space<vmem>>, %arg3: memref<4x32xf32, #tpu.memory_space<vmem>>, %arg4: memref<4x1xf32, #tpu.memory_space<vmem>>, %arg5: memref<32x4xf32, #tpu.memory_space<vmem>>, %arg6: memref<32x1xf32, #tpu.memory_space<vmem>>, %arg7: memref<1x32x1xf32, #tpu.memory_space<vmem>>, %arg8: memref<32x128xf32, #tpu.memory_space<vmem>>) attributes {dimension_semantics = [#tpu.dimension_semantics<parallel>, #tpu.dimension_semantics<arbitrary>], iteration_bounds = array<i64: 2, 1>, scalar_prefetch = 0 : i64, scratch_operands = 1 : i64, tpu.core_type = #tpu.core_type<tc>, window_params = [{transform_indices = @transform_0, window_bounds = array<i64: 1, 32, 256>}, {pipeline_mode = #tpu.pipeline_mode<synchronous>, transform_indices = @transform_1, window_bounds = array<i64: 4, 32>}, {pipeline_mode = #tpu.pipeline_mode<synchronous>, transform_indices = @transform_2, window_bounds = array<i64: 4, 1>}, {pipeline_mode = #tpu.pipeline_mode<synchronous>, transform_indices = @transform_3, window_bounds = array<i64: 32, 4>}, {pipeline_mode = #tpu.pipeline_mode<synchronous>, transform_indices = @transform_4, window_bounds = array<i64: 32, 1>}, {transform_indices = @transform_5, window_bounds = array<i64: 1, 32, 1>}]} {
    %c0_i32 = arith.constant 0 : i32
    %0 = arith.cmpi eq, %arg1, %c0_i32 : i32
    %1 = arith.extui %0 : i1 to i32
    %c0_i32_0 = arith.constant 0 : i32
    %2 = arith.cmpi ne, %1, %c0_i32_0 : i32
    scf.if %2 {
      %cst = arith.constant 0.000000e+00 : f32
      %14 = vector.broadcast %cst : f32 to vector<32x128xf32>
      %c0_11 = arith.constant 0 : index
      %c0_12 = arith.constant 0 : index
      %15 = vector.load %arg8[%c0_11, %c0_12] : memref<32x128xf32, #tpu.memory_space<vmem>>, vector<32x128xf32>
      tpu.vector_store %arg8[%c0_11, %c0_12], %14 {strides = array<i32>} : memref<32x128xf32, #tpu.memory_space<vmem>>, vector<32x128xf32>,
    } else {
    }
    %c0 = arith.constant 0 : index
    %c0_1 = arith.constant 0 : index
    %3 = vector.load %arg8[%c0, %c0_1] : memref<32x128xf32, #tpu.memory_space<vmem>>, vector<32x128xf32>
    %c0_2 = arith.constant 0 : index
    %c0_3 = arith.constant 0 : index
    %c0_4 = arith.constant 0 : index
    %4 = vector.load %arg2[%c0_2, %c0_3, %c0_4] : memref<1x32x256xf32, #tpu.memory_space<vmem>>, vector<1x32x128xf32>
    %5 = vector.shape_cast %4 : vector<1x32x128xf32> to vector<32x128xf32>
    %6 = arith.addf %3, %5 : vector<32x128xf32>
    %c0_5 = arith.constant 0 : index
    %c0_6 = arith.constant 0 : index
    %c128 = arith.constant 128 : index
    %7 = vector.load %arg2[%c0_5, %c0_6, %c128] : memref<1x32x256xf32, #tpu.memory_space<vmem>>, vector<1x32x128xf32>
    %8 = vector.shape_cast %7 : vector<1x32x128xf32> to vector<32x128xf32>
    %9 = arith.addf %6, %8 : vector<32x128xf32>
    %c0_7 = arith.constant 0 : index
    %c0_8 = arith.constant 0 : index
    %10 = vector.load %arg8[%c0_7, %c0_8] : memref<32x128xf32, #tpu.memory_space<vmem>>, vector<32x128xf32>
    tpu.vector_store %arg8[%c0_7, %c0_8], %9 {strides = array<i32>} : memref<32x128xf32, #tpu.memory_space<vmem>>, vector<32x128xf32>,
    %c0_i32_9 = arith.constant 0 : i32
    %11 = arith.cmpi eq, %arg1, %c0_i32_9 : i32
    %12 = arith.extui %11 : i1 to i32
    %c0_i32_10 = arith.constant 0 : i32
    %13 = arith.cmpi ne, %12, %c0_i32_10 : i32
    scf.if %13 {
      %c0_11 = arith.constant 0 : index
      %c0_12 = arith.constant 0 : index
      %14 = vector.load %arg8[%c0_11, %c0_12] : memref<32x128xf32, #tpu.memory_space<vmem>>, vector<32x128xf32>
      %cst = arith.constant dense<0.000000e+00> : vector<32xf32>
      %15 = vector.multi_reduction <add>, %14, %cst [1] : vector<32x128xf32> to vector<32xf32>
      %16 = vector.shape_cast %15 : vector<32xf32> to vector<32x1xf32>
      %cst_13 = arith.constant 3.906250e-03 : f32
      %17 = vector.broadcast %cst_13 : f32 to vector<32x1xf32>
      %18 = arith.mulf %16, %17 : vector<32x1xf32>
      %c0_14 = arith.constant 0 : index
      %c0_15 = arith.constant 0 : index
      %19 = vector.load %arg3[%c0_14, %c0_15] : memref<4x32xf32, #tpu.memory_space<vmem>>, vector<4x32xf32>
      %cst_16 = arith.constant dense<0.000000e+00> : vector<4x1xf32>
      %20 = tpu.matmul %19, %18, %cst_16 {dimension_numbers = #tpu.dot_dimension_numbers<[1], [0], [0], [1], [0, 0, 1, 1], [], []>} : vector<4x32xf32>, vector<32x1xf32>, vector<4x1xf32> -> vector<4x1xf32>
      %c0_17 = arith.constant 0 : index
      %c0_18 = arith.constant 0 : index
      %21 = vector.load %arg4[%c0_17, %c0_18] : memref<4x1xf32, #tpu.memory_space<vmem>>, vector<4x1xf32>
      %22 = arith.addf %20, %21 : vector<4x1xf32>
      %cst_19 = arith.constant 0.000000e+00 : f32
      %23 = vector.broadcast %cst_19 : f32 to vector<4x1xf32>
      %24 = arith.maximumf %22, %23 : vector<4x1xf32>
      %c0_20 = arith.constant 0 : index
      %c0_21 = arith.constant 0 : index
      %25 = vector.load %arg5[%c0_20, %c0_21] : memref<32x4xf32, #tpu.memory_space<vmem>>, vector<32x4xf32>
      %cst_22 = arith.constant dense<0.000000e+00> : vector<32x1xf32>
      %26 = tpu.matmul %25, %24, %cst_22 {dimension_numbers = #tpu.dot_dimension_numbers<[1], [0], [0], [1], [0, 0, 1, 1], [], []>} : vector<32x4xf32>, vector<4x1xf32>, vector<32x1xf32> -> vector<32x1xf32>
      %c0_23 = arith.constant 0 : index
      %c0_24 = arith.constant 0 : index
      %27 = vector.load %arg6[%c0_23, %c0_24] : memref<32x1xf32, #tpu.memory_space<vmem>>, vector<32x1xf32>
      %28 = arith.addf %26, %27 : vector<32x1xf32>
      %c0_25 = arith.constant 0 : index
      %c0_26 = arith.constant 0 : index
      %c0_27 = arith.constant 0 : index
      %29 = vector.load %arg7[%c0_25, %c0_26, %c0_27] : memref<1x32x1xf32, #tpu.memory_space<vmem>>, vector<1x32x1xf32>
      %30 = vector.shape_cast %29 : vector<1x32x1xf32> to vector<32x1xf32>
      %31 = vector.shape_cast %28 : vector<32x1xf32> to vector<1x32x1xf32>
      tpu.vector_store %arg7[%c0_25, %c0_26, %c0_27], %31 {strides = array<i32>} : memref<1x32x1xf32, #tpu.memory_space<vmem>>, vector<1x32x1xf32>,
    } else {
    }
    return
  }
  func.func @transform_0(%arg0: i32, %arg1: i32) -> (i32, i32, i32) {
    %c0_i32 = arith.constant 0 : i32
    %c0_i32_0 = arith.constant 0 : i32
    return %arg0, %c0_i32, %arg1 : i32, i32, i32
  }
  func.func @transform_1(%arg0: i32, %arg1: i32) -> (i32, i32) {
    %c0_i32 = arith.constant 0 : i32
    %c0_i32_0 = arith.constant 0 : i32
    %c0_i32_1 = arith.constant 0 : i32
    return %c0_i32, %c0_i32_0 : i32, i32
  }
  func.func @transform_2(%arg0: i32, %arg1: i32) -> (i32, i32) {
    %c0_i32 = arith.constant 0 : i32
    %c0_i32_0 = arith.constant 0 : i32
    %c0_i32_1 = arith.constant 0 : i32
    return %c0_i32, %c0_i32_0 : i32, i32
  }
  func.func @transform_3(%arg0: i32, %arg1: i32) -> (i32, i32) {
    %c0_i32 = arith.constant 0 : i32
    %c0_i32_0 = arith.constant 0 : i32
    %c0_i32_1 = arith.constant 0 : i32
    return %c0_i32, %c0_i32_0 : i32, i32
  }
  func.func @transform_4(%arg0: i32, %arg1: i32) -> (i32, i32) {
    %c0_i32 = arith.constant 0 : i32
    %c0_i32_0 = arith.constant 0 : i32
    %c0_i32_1 = arith.constant 0 : i32
    return %c0_i32, %c0_i32_0 : i32, i32
  }
  func.func @transform_5(%arg0: i32, %arg1: i32) -> (i32, i32, i32) {
    %c0_i32 = arith.constant 0 : i32
    %c0_i32_0 = arith.constant 0 : i32
    %c0_i32_1 = arith.constant 0 : i32
    return %arg0, %c0_i32, %c0_i32_0 : i32, i32, i32
  }
}

</mosaic_0001>

<bundles_post_ra>
// kernel: tpu_custom_call.1
= control target key start
LH: loop header
LB: loop body
LE: loop exit
PB: predicated region body
PF: predicated region fallthrough
CT: control target
= control target key end

     0   :  { %10 = vsyncpa [#allocation4], 0  ;;  %s933_s0 = inlined_call_operand.hbm [shape: f32[2,32,256], index: 0, kind: input, shape index: {}]   ;;  %s934_s1 = inlined_call_operand.vmem [shape: f32[4,32], index: 1, kind: input, shape index: {}]   ;;  %s935_s2 = inlined_call_operand.vmem [shape: f32[4,1], index: 2, kind: input, shape index: {}]   ;;  %s936_s3 = inlined_call_operand.vmem [shape: f32[32,4], index: 3, kind: input, shape index: {}]   ;;  %s937_s4 = inlined_call_operand.vmem [shape: f32[32,1], index: 4, kind: input, shape index: {}]   ;;  %s938_s5 = inlined_call_operand.vmem [shape: f32[2,32,1], index: 5, kind: output, shape index: {}]  }
   0x1   :  { %12 = vsyncpa [#allocation4 + $0x1], 0  ;;  %s807_s18 = smov 0   ;;  %s809_s19 = smov 0  }
   0x2   :  { %s811_s20 = smov 0   ;;  %s813_s21 = smov 0  }
   0x3   :  { %s815_s22 = smov 0   ;;  %s817_s23 = smov 0  }
   0x4 LB: > { %s583_s24 = sadd.s32 4294967295, %s770_s23   ;;  %s30_s25 = sadd.s32 1, %s766_s22  ;;  %s770_s23 = sphi %s817_s23, %s18_s23   ;;  %s766_s22 = sphi %s815_s22, %s946_s22   ;;  %s762_s21 = sphi %s813_s21, %s945_s21   ;;  %s758_s20 = sphi %s811_s20, %s944_s20   ;;  %s754_s19 = sphi %s809_s19, %s943_s19   ;;  %s750_s18 = sphi %s807_s18, %s942_s18  }
   0x5   : > { %p32_p0 = scmp.ge.s32.totalorder %s30_s25, 2  ;;  %s39_s26 = sadd.s32 1, %s758_s20 }
   0x6   : > { %p46_p1 = scmp.ne.s32.totalorder %s758_s20, %s754_s19  ;;  %p47_p2 = scmp.eq.s32.totalorder %s770_s23, 0 }
   0x7   : > { %s948_s25 = smov (%p32_p0, %s30_s25), 0  ;;  %p52_p4 = scmp.ne.s32.totalorder %s754_s19, %s750_s18 }
   0x8   : > { %p843_p3 = por %p47_p2, %p46_p1  ;;  %s34_s28 = ssub.s32 %s766_s22, %s948_s25 }
   0x9   : > { %p53_p5 = scmp.eq.s32.totalorder %s583_s24, 0  ;;  %p37_p6 = scmp.eq.s32.totalorder %s34_s28, 0 }
   0xa   : > { %p639_p8 = scmp.lt.s32.totalorder %s770_s23, 2  ;;  %s198_s6 = sand.u32 1, %s758_s20  }
   0xb   : > { %p850_p7 = por %p53_p5, %p52_p4  ;;  %s602_s7 = sshll.u32 %s766_s22, 10 }
   0xc   : > { %s856_s30 = scalar_select %p37_p6, %s758_s20, %s39_s26  }
   0xd   : > { %s587_s8 = sshll.u32 %s198_s6, 6  ;;  %s210_s11 = scalar_lea.hbm %s933_s0, %s602_s7 }
   0xe   : > { %s202_s12 = scalar_lea.vmem [#allocation3], %s587_s8  ;;  %p865_p9 = pnand %p639_p8, %p843_p3 }
   0xf   : > { %s211_s13 = sshll.u32 %s202_s12, 4  ;;  %s199_s15 = scalar_lea.sflag [#allocation4], %s198_s6  ;;  %s212_s13 = int_to_ptr.vmem [resolvable:$true] %s211_s13 }
  0x10   : > { %p694_p10 = pneg %p865_p9  ;;  %s705_s16 = scalar_lea.vmem %s212_s13, 1024 }
  0x11   : > { %p706_p11 = scmp.ne.s32.totalorder %s212_s13, %s705_s16  ;;  %s772_s17 = smov [#allocation3]  }
  0x12   : > { %s710_s18 = sshll.u32 %s772_s17, 4  ;;  %s711_s18 = int_to_ptr.vmem [resolvable:$false] %s710_s18 }
  0x13   : > { %p708_p12 = pnand %p706_p11, %p694_p10  ;;  %s712_s24 = scalar_lea.vmem %s711_s18, 2048 }
  0x14   : > { %p713_p0 = scmp.lt.s32.totalorder %s212_s13, %s711_s18  ;;  %p714_p1 = scmp.lt.s32.totalorder %s712_s24, %s705_s16 }
  0x15   : > { %p709_p13 = pneg %p708_p12 }
  0x16   : > { %p715_p2 = por %p714_p1, %p713_p0 }
  0x18   : > { %p716_p3 = pnand %p715_p2, %p709_p13 }
  0x1a   : > { %719 = shalt.err (!%p716_p3)
}
  0x1b   : > { %s773_s26 = smov 256   ;;  %s774_s27 = smov 16  }
  0x1c   : > { %638 = dma.hbm_to_vmem [thread:$0]  (!%p865_p9), %s210_s11, 1024, %s212_s13, %s199_s15, %s773_s26, %s773_s26, %s774_s27  }
  0x1d   : > { %p590_p4 = scmp.ge.s32.totalorder %s770_s23, 1  ;;  %p219_p5 = scmp.lt.s32.totalorder %s770_s23, 3 }
  0x1f   : > { %p220_p6 = pnand %p590_p4, %p219_p5 }
  0x20   : > { %s225_s28 = sand.u32 (!%p220_p6), 1, %s754_s19  }
  0x21   : > { %223 = sbr.rel (%p220_p6) target bundleno = 592 (0x250), region = 40  ;;  %s591_s6 = sshll.u32 (!%p220_p6), %s225_s28, 6 }
  0x22   : > { %s226_s7 = scalar_lea.sflag (!%p220_p6), [#allocation4], %s225_s28  ;;  %s229_s8 = scalar_lea.vmem (!%p220_p6), [#allocation3], %s591_s6 }
  0x26   : > { %745 = dma.done.wait (%p850_p7), %s226_s7, 1024  }
  0x27   : > { %747 = vsyncadd (%p850_p7), %s226_s7, 4294966272  ;;  %v277_v0 = vld [vmem:[%s229_s8 + $0x30] sm:$0xff]  ;;  %v285_v1 = vld [vmem:[%s229_s8 + $0x38] sm:$0xff]  ;;  %v775_v12 = vmov 0.0   ;;  %vm776_vm0 = vmmov 0   ;;  %vm315_vm1 = vcmask 261120  }
  0x28   : > { %v276_v2 = vld [vmem:[%s229_s8 + $0x20] sm:$0xff]  ;;  %v289_v3 = vadd.f32 %v285_v1, %v277_v0  ;;  %v284_v4 = vld [vmem:[%s229_s8 + $0x28] sm:$0xff]  ;;  %v275_v5 = vld [vmem:[%s229_s8 + $0x10] sm:$0xff]  ;;  %614 = vmatprep.subr.mxu0 %v775_v12  ;;  %622 = vmatprep.mubr.msk.f32.mxu0 %vm776_vm0, %v775_v12  ;;  %vm398_vm2 = vcmask 31744   ;;  %vm411_vm3 = vcmask 1043456   ;;  %p257_p7 = scmp.lt.s32.totalorder %s762_s21, 1 }
  0x29   : > { %v283_v6 = vld [vmem:[%s229_s8 + $0x18] sm:$0xff]  ;;  %v274_v8 = vld [vmem:[%s229_s8] sm:$0xff]  ;;  %v282_v9 = vld [vmem:[%s229_s8 + $0x8] sm:$0xff]  ;;  %v288_v10 = vadd.f32 %v284_v4, %v276_v2  ;;  %vm500_vm4 = vcmask 7168  }
  0x2a   : > { %v287_v7 = vadd.f32 %v283_v6, %v275_v5  ;;  %307 = vadd.xlane.f32.xlu0 %v289_v3  ;;  %v286_v11 = vadd.f32 %v282_v9, %v274_v8  ;;  %v313_v21 = vld [vmem:[%s934_s1] sm:$0xf]  ;;  %v391_v28 = vld [vmem:[%s936_s3 + $0x8] sm:$0xff]  ;;  %v392_v29 = vld [vmem:[%s936_s3 + $0x10] sm:$0xff]  ;;  %s950_s21 = smov (!%p257_p7, %s762_s21), 1 }
  0x2b   : > { %v390_v22 = vld [vmem:[%s936_s3] sm:$0xff]  ;;  %v393_v30 = vld [vmem:[%s936_s3 + $0x18] sm:$0xff]  ;;  %s603_s26 = sshll.u32 %s950_s21, 5  ;;  %v395_v31 = vld [vmem:[%s937_s4 + $0x8] sm:$0xff] }
  0x2c   : > { %303 = vadd.xlane.f32.xlu1 %v287_v7  ;;  %627 = vmatprep.mubr.msk.f32.mxu1 %vm398_vm2, %v390_v22  ;;  %v314_v23 = vld [vmem:[%s935_s2] sm:$0xf]  ;;  %s261_s8 = scalar_lea.vmem %s938_s5, %s603_s26  ;;  %v397_v36 = vld [vmem:[%s937_s4 + $0x18] sm:$0xff]  ;;  %v396_v39 = vld [vmem:[%s937_s4 + $0x10] sm:$0xff] }
  0x2d   : > { %v394_v33 = vld [vmem:[%s937_s4] sm:$0xff] }
  0x2e   : > { %305 = vadd.xlane.f32.xlu0 %v288_v10 }
  0x30   : > { %301 = vadd.xlane.f32.xlu1 %v286_v11 }
  0xb3   : > { %v308_v13 = vpop.xlane.xlu0 %307 }
  0xb4   : > { %v312_v14 = vmul.f32 0.00390625, %v308_v13 }
  0xb5   : > { %v304_v15 = vpop.xlane.xlu1 %303 }
  0xb6   : > { %615 = vmatpush3.msra.mxu0 %v312_v14  ;;  %v310_v19 = vmul.f32 0.00390625, %v304_v15 }
  0xb7   : > { %v306_v16 = vpop.xlane.xlu0 %305  ;;  %616 = vmatprep.subr.mxu0 %v775_v12 }
  0xb8   : > { %v311_v17 = vmul.f32 0.00390625, %v306_v16 }
  0xb9   : > { %v302_v18 = vpop.xlane.xlu1 %301 }
  0xba   : > { %617 = vmatpush3.msra.mxu0 %v311_v17  ;;  %v309_v20 = vmul.f32 0.00390625, %v302_v18 }
  0xbb   : > { %618 = vmatprep.subr.mxu0 %v775_v12 }
  0xbc   : > { %619 = vmatpush3.msra.mxu0 %v310_v19 }
  0xbd   : > { %620 = vmatprep.subr.mxu0 %v775_v12 }
  0xbe   : > { %621 = vmatpush3.msra.mxu0 %v309_v20 }
  0xbf   : > { %623 = vmatmul.mubr.msk.f32.vlgmr.msra.gmra.mxu0 %vm315_vm1, %v313_v21 }
 0x17f   : > { %v385_v24 = vpop.f32.mrf.mxu0 }
 0x180   : > { %v386_v25 = vadd.f32 %v385_v24, %v314_v23 }
 0x181   : > { %v624_v26 = vpop.f32.mrf.mxu0 }
 0x182   : > { %v389_v27 = vmax.f32 %v386_v25, 0.0 }
 0x184   : > { %625 = vmatprep.subr.msk.mxu1 %vm411_vm3, %v389_v27 }
 0x185   : > { %626 = vmatpush3.msk.msra.mxu1 %vm411_vm3, %v389_v27 }
 0x186   : > { %628 = vmatmul.mubr.msk.f32.vlgmr.msra.gmra.mxu1 %vm398_vm2, %v391_v28 }
 0x187   : > { %630 = vmatprep.mubr.msk.f32.mxu1 %vm398_vm2, %v392_v29 }
 0x18a   : > { %631 = vmatmul.mubr.msk.f32.gmra.mxu1 %vm398_vm2, %v393_v30 }
 0x246   : > { %v629_v32 = vpop.f32.mrf.mxu1 }
 0x247   : > { %v487_v34 = vadd.f32 %v629_v32, %v395_v31 }
 0x248   : > { %v481_v35 = vpop.f32.mrf.mxu1 }
 0x249   : > { %502 = vst.msk [vmem:[%s261_s8 + $0x8] sm:$0xff] %vm500_vm4, %v487_v34  ;;  %v482_v37 = vadd.f32 %v481_v35, %v394_v33 }
 0x24a   : > { %v632_v38 = vpop.f32.mrf.mxu1 }
 0x24b   : > { %501 = vst.msk [vmem:[%s261_s8] sm:$0xff] %vm500_vm4, %v482_v37  ;;  %v497_v40 = vadd.f32 %v632_v38, %v397_v36 }
 0x24c   : > { %v491_v41 = vpop.f32.mrf.mxu1 }
 0x24d   : > { %504 = vst.msk [vmem:[%s261_s8 + $0x18] sm:$0xff] %vm500_vm4, %v497_v40  ;;  %v492_v42 = vadd.f32 %v491_v41, %v396_v39 }
 0x24f   : > { %503 = vst.msk [vmem:[%s261_s8 + $0x10] sm:$0xff] %vm500_vm4, %v492_v42 }
 0x250 PF: > { %s18_s23 = sadd.s32 1, %s770_s23   ;;  %s942_s18 = smov %s754_s19 }
 0x251   : > { %p15_p8 = scmp.ge.s32.totalorder %s18_s23, 4   ;;  %s943_s19 = smov %s758_s20 }
 0x252   : > { %s944_s20 = smov %s856_s30  ;;  %s945_s21 = smov %s766_s22 }
 0x253   : > { %s946_s22 = smov %s948_s25  ;;  %17 = sbr.rel (!%p15_p8) target bundleno = 4 (0x4), region = 88 }
 0x258   :  { %526 = vsyncpa [#allocation4], 1 }
 0x259   :  { %528 = vsyncpa [#allocation4 + $0x1], 1 }

</bundles_post_ra>
